<compile_context>
chip_gen: v7x
topology: tpu7x:2x2x1
jax: 0.10.0
libtpu: 0.0.40
codegen_flags: <defaults>
</compile_context>

<pallas_src>
import functools

import jax
import jax.numpy as jnp
from jax import lax
from jax.experimental import pallas as pl
from jax.experimental.pallas import tpu as pltpu

DEFAULT_EPS = 1e-5
_VMEM_LIMIT_BYTES = 32 * 1024 * 1024    # safe scoped limit on v5e / v6e / v7x
_FAST_PATH_MAX_BYTES = 4 * 1024 * 1024  # fused single-block path threshold
_TILE_BYTES_BUDGET = 2 * 1024 * 1024    # per activation block (x + out, double-buffered)


# ----------------------------------------------------------------------------
# Kernels
# ----------------------------------------------------------------------------
def _fused_bn_kernel(x_ref, w_ref, b_ref, o_ref, *, eps, inv_numel):
    """Whole-tensor fast path: x_ref is (N, C, HW) in VMEM."""
    x = x_ref[...].astype(jnp.float32)                                   # (N, C, HW)
    s = jnp.sum(jnp.sum(x, axis=2, keepdims=True), axis=0, keepdims=True)      # (1, C, 1)
    ssq = jnp.sum(jnp.sum(x * x, axis=2, keepdims=True), axis=0, keepdims=True)
    mean = s * inv_numel
    bias_var = (ssq - s * mean) * inv_numel                              # biased variance
    inv_std = lax.rsqrt(bias_var + eps)
    scale = w_ref[...] * inv_std                                         # (1, C, 1)
    shift = b_ref[...] - mean * scale
    o_ref[...] = (x * scale + shift).astype(o_ref.dtype)


def _bn_stats_kernel(x_ref, w_ref, b_ref, scale_ref, shift_ref,
                     sum_acc, ssq_acc, *, eps, inv_numel):
    """Pass 1: accumulate per-channel sum / sum-of-squares, emit scale/shift."""
    n = pl.program_id(0)
    t = pl.program_id(1)

    @pl.when((n == 0) & (t == 0))
    def _init():
        sum_acc[...] = jnp.zeros_like(sum_acc)
        ssq_acc[...] = jnp.zeros_like(ssq_acc)

    x = x_ref[...].astype(jnp.float32)                        # (C, hw_tile)
    sum_acc[...] += jnp.sum(x, axis=-1, keepdims=True)        # (C, 1)
    ssq_acc[...] += jnp.sum(x * x, axis=-1, keepdims=True)    # (C, 1)

    @pl.when((n == pl.num_programs(0) - 1) & (t == pl.num_programs(1) - 1))
    def _finalize():
        s = sum_acc[...]
        mean = s * inv_numel
        bias_var = (ssq_acc[...] - s * mean) * inv_numel      # biased variance
        inv_std = lax.rsqrt(bias_var + eps)
        scale = w_ref[...] * inv_std
        scale_ref[...] = scale
        shift_ref[...] = b_ref[...] - mean * scale


def _bn_apply_kernel(x_ref, scale_ref, shift_ref, o_ref):
    """Pass 2: out = x * scale + shift (per-channel, lane-broadcast FMA)."""
    x = x_ref[...].astype(jnp.float32)                        # (C, hw_tile)
    o_ref[...] = (x * scale_ref[...] + shift_ref[...]).astype(o_ref.dtype)


# ----------------------------------------------------------------------------
# Wrapper
# ----------------------------------------------------------------------------
def _pick_hw_tile(hw, c, itemsize):
    """Largest multiple-of-128 divisor of hw whose block fits the VMEM budget."""
    if hw % 128 != 0:
        # TODO(synk): ragged spatial sizes fall back to a single full-width block.
        return hw
    # budget covers double-buffered input block + double-buffered output block
    max_elems = max(_TILE_BYTES_BUDGET // (4 * max(c, 1) * itemsize), 128)
    tile = min((max_elems // 128) * 128, hw)
    tile = max(tile, 128)
    while hw % tile != 0:     # hw is a multiple of 128, so this terminates at 128
        tile -= 128
    return tile


def batchnorm2d_forward(x_nchw, weight, bias, eps=DEFAULT_EPS, *,
                        force_tiled=False, hw_tile=None):
    """Forward pass of BatchNorm2dReimpl (training-mode batch statistics)."""
    N, C, H, W = x_nchw.shape
    HW = H * W
    inv_numel = 1.0 / float(N * HW)

    x = x_nchw.reshape(N, C, HW)                 # free: collapses H,W, no transpose
    w2 = weight.astype(jnp.float32).reshape(C, 1)
    b2 = bias.astype(jnp.float32).reshape(C, 1)

    itemsize = jnp.dtype(x.dtype).itemsize
    total_bytes = x.size * itemsize

    # TODO(synk): running_mean / running_var buffer updates (training-mode side
    # state of the nn.Module) are not produced; only the normalized output is.

    if (not force_tiled) and total_bytes <= _FAST_PATH_MAX_BYTES:
        # Fused fast path: one HBM read of x, stats + apply in a single block.
        out = pl.pallas_call(
            functools.partial(_fused_bn_kernel, eps=eps, inv_numel=inv_numel),
            out_shape=jax.ShapeDtypeStruct((N, C, HW), x.dtype),
            in_specs=[
                pl.BlockSpec(memory_space=pltpu.MemorySpace.VMEM),  # x
                pl.BlockSpec(memory_space=pltpu.MemorySpace.VMEM),  # weight
                pl.BlockSpec(memory_space=pltpu.MemorySpace.VMEM),  # bias
            ],
            out_specs=pl.BlockSpec(memory_space=pltpu.MemorySpace.VMEM),
            compiler_params=pltpu.CompilerParams(
                vmem_limit_bytes=_VMEM_LIMIT_BYTES),
        )(x, w2, b2)
        return out.reshape(N, C, H, W)

    tile = hw_tile if hw_tile is not None else _pick_hw_tile(HW, C, itemsize)
    assert HW % tile == 0, "hw_tile must divide H*W"
    grid = (N, HW // tile)

    # Pass 1: per-channel scale / shift from streamed sum and sum-of-squares.
    scale, shift = pl.pallas_call(
        functools.partial(_bn_stats_kernel, eps=eps, inv_numel=inv_numel),
        out_shape=(jax.ShapeDtypeStruct((C, 1), jnp.float32),
                   jax.ShapeDtypeStruct((C, 1), jnp.float32)),
        grid=grid,
        in_specs=[
            pl.BlockSpec((None, C, tile), lambda n, t: (n, 0, t)),  # x
            pl.BlockSpec((C, 1), lambda n, t: (0, 0)),              # weight
            pl.BlockSpec((C, 1), lambda n, t: (0, 0)),              # bias
        ],
        out_specs=(
            pl.BlockSpec((C, 1), lambda n, t: (0, 0)),              # scale
            pl.BlockSpec((C, 1), lambda n, t: (0, 0)),              # shift
        ),
        scratch_shapes=[pltpu.VMEM((C, 1), jnp.float32),
                        pltpu.VMEM((C, 1), jnp.float32)],
        compiler_params=pltpu.CompilerParams(
            dimension_semantics=("arbitrary", "arbitrary"),
            vmem_limit_bytes=_VMEM_LIMIT_BYTES),
    )(x, w2, b2)

    # Pass 2: streaming per-channel FMA, parallel over batch and spatial tiles.
    out = pl.pallas_call(
        _bn_apply_kernel,
        out_shape=jax.ShapeDtypeStruct((N, C, HW), x.dtype),
        grid=grid,
        in_specs=[
            pl.BlockSpec((None, C, tile), lambda n, t: (n, 0, t)),  # x
            pl.BlockSpec((C, 1), lambda n, t: (0, 0)),              # scale
            pl.BlockSpec((C, 1), lambda n, t: (0, 0)),              # shift
        ],
        out_specs=pl.BlockSpec((None, C, tile), lambda n, t: (n, 0, t)),
        compiler_params=pltpu.CompilerParams(
            dimension_semantics=("parallel", "parallel"),
            vmem_limit_bytes=_VMEM_LIMIT_BYTES),
    )(x, scale, shift)

    return out.reshape(N, C, H, W)


# ----------------------------------------------------------------------------
# Self-test
# ----------------------------------------------------------------------------
if __name__ == "__main__":
    N, C, H, W = 2, 4, 16, 16
    eps = 1e-5

    key = jax.random.PRNGKey(0)
    kx, kw, kb = jax.random.split(key, 3)
    x = jax.random.normal(kx, (N, C, H, W), dtype=jnp.float32)
    weight = jax.random.uniform(kw, (C,), dtype=jnp.float32)     # init.uniform_(weight)
    bias = jax.random.normal(kb, (C,), dtype=jnp.float32) * 0.1

    # Exercise both paths: fused fast path and the tiled two-pass path.
    out_fast = batchnorm2d_forward(x, weight, bias, eps=eps)
    out_tiled = batchnorm2d_forward(x, weight, bias, eps=eps,
                                    force_tiled=True, hw_tile=128)
    out_fast, out_tiled = jax.block_until_ready((out_fast, out_tiled))

    # Pure-JAX reference mirroring the PyTorch module's math exactly.
    numel = N * H * W
    xr = jnp.transpose(x, (1, 0, 2, 3)).reshape(C, numel)
    s = xr.sum(axis=1)
    ssq = (xr * xr).sum(axis=1)
    mean = s / numel
    sumvar = ssq - s * mean
    bias_var = sumvar / numel
    inv_std = 1.0 / jnp.sqrt(bias_var + eps)
    ref = (xr - mean[:, None]) * inv_std[:, None] * weight[:, None] + bias[:, None]
    ref = jnp.transpose(ref.reshape(C, N, H, W), (1, 0, 2, 3))

    assert out_fast.shape == (N, C, H, W)
    assert jnp.allclose(out_fast, ref, atol=1e-4, rtol=1e-4), "fast-path mismatch"
    assert jnp.allclose(out_tiled, ref, atol=1e-4, rtol=1e-4), "tiled-path mismatch"

    print("KERNEL_OK")
</pallas_src>

<mosaic_0001>
module attributes {stable_mosaic.version = 11 : i64} {
  func.func @_fused_bn_kernel(%arg0: memref<2x4x256xf32, #tpu.memory_space<vmem>>, %arg1: memref<4x1xf32, #tpu.memory_space<vmem>>, %arg2: memref<4x1xf32, #tpu.memory_space<vmem>>, %arg3: memref<2x4x256xf32, #tpu.memory_space<vmem>>) attributes {dimension_semantics = [], scalar_prefetch = 0 : i64, scratch_operands = 0 : i64, tpu.core_type = #tpu.core_type<tc>} {
    %c0 = arith.constant 0 : index
    %c0_0 = arith.constant 0 : index
    %c0_1 = arith.constant 0 : index
    %0 = vector.load %arg0[%c0, %c0_0, %c0_1] : memref<2x4x256xf32, #tpu.memory_space<vmem>>, vector<2x4x256xf32>
    %cst = arith.constant dense<0.000000e+00> : vector<2x4xf32>
    %1 = vector.multi_reduction <add>, %0, %cst [2] : vector<2x4x256xf32> to vector<2x4xf32>
    %2 = vector.shape_cast %1 : vector<2x4xf32> to vector<2x4x1xf32>
    %cst_2 = arith.constant dense<0.000000e+00> : vector<4x1xf32>
    %3 = vector.multi_reduction <add>, %2, %cst_2 [0] : vector<2x4x1xf32> to vector<4x1xf32>
    %4 = vector.shape_cast %3 : vector<4x1xf32> to vector<1x4x1xf32>
    %5 = arith.mulf %0, %0 : vector<2x4x256xf32>
    %cst_3 = arith.constant dense<0.000000e+00> : vector<2x4xf32>
    %6 = vector.multi_reduction <add>, %5, %cst_3 [2] : vector<2x4x256xf32> to vector<2x4xf32>
    %7 = vector.shape_cast %6 : vector<2x4xf32> to vector<2x4x1xf32>
    %cst_4 = arith.constant dense<0.000000e+00> : vector<4x1xf32>
    %8 = vector.multi_reduction <add>, %7, %cst_4 [0] : vector<2x4x1xf32> to vector<4x1xf32>
    %9 = vector.shape_cast %8 : vector<4x1xf32> to vector<1x4x1xf32>
    %cst_5 = arith.constant 0.001953125 : f32
    %10 = vector.broadcast %cst_5 : f32 to vector<1x4x1xf32>
    %11 = arith.mulf %4, %10 : vector<1x4x1xf32>
    %12 = arith.mulf %4, %11 : vector<1x4x1xf32>
    %13 = arith.subf %9, %12 : vector<1x4x1xf32>
    %cst_6 = arith.constant 0.001953125 : f32
    %14 = vector.broadcast %cst_6 : f32 to vector<1x4x1xf32>
    %15 = arith.mulf %13, %14 : vector<1x4x1xf32>
    %cst_7 = arith.constant 9.99999974E-6 : f32
    %16 = vector.broadcast %cst_7 : f32 to vector<1x4x1xf32>
    %17 = arith.addf %15, %16 : vector<1x4x1xf32>
    %18 = math.rsqrt %17 : vector<1x4x1xf32>
    %c0_8 = arith.constant 0 : index
    %c0_9 = arith.constant 0 : index
    %19 = vector.load %arg1[%c0_8, %c0_9] : memref<4x1xf32, #tpu.memory_space<vmem>>, vector<4x1xf32>
    %20 = vector.shape_cast %19 : vector<4x1xf32> to vector<1x4x1xf32>
    %21 = arith.mulf %20, %18 : vector<1x4x1xf32>
    %c0_10 = arith.constant 0 : index
    %c0_11 = arith.constant 0 : index
    %22 = vector.load %arg2[%c0_10, %c0_11] : memref<4x1xf32, #tpu.memory_space<vmem>>, vector<4x1xf32>
    %23 = arith.mulf %11, %21 : vector<1x4x1xf32>
    %24 = vector.shape_cast %22 : vector<4x1xf32> to vector<1x4x1xf32>
    %25 = arith.subf %24, %23 : vector<1x4x1xf32>
    %26 = vector.broadcast %21 : vector<1x4x1xf32> to vector<2x4x256xf32>
    %27 = arith.mulf %0, %26 : vector<2x4x256xf32>
    %28 = vector.broadcast %25 : vector<1x4x1xf32> to vector<2x4x256xf32>
    %29 = arith.addf %27, %28 : vector<2x4x256xf32>
    %c0_12 = arith.constant 0 : index
    %c0_13 = arith.constant 0 : index
    %c0_14 = arith.constant 0 : index
    %30 = vector.load %arg3[%c0_12, %c0_13, %c0_14] : memref<2x4x256xf32, #tpu.memory_space<vmem>>, vector<2x4x256xf32>
    tpu.vector_store %arg3[%c0_12, %c0_13, %c0_14], %29 {strides = array<i32>} : memref<2x4x256xf32, #tpu.memory_space<vmem>>, vector<2x4x256xf32>,
    return
  }
}

</mosaic_0001>

<bundles_post_ra>
// kernel: tpu_custom_call.1
= control target key start
LH: loop header
LB: loop body
LE: loop exit
PB: predicated region body
PF: predicated region fallthrough
CT: control target
= control target key end

     0   :  { %8 = vsyncpa [#allocation3], 0  ;;  %s264_s0 = inlined_call_operand.hbm [shape: f32[2,4,256], index: 0, kind: input, shape index: {}]   ;;  %s265_s1 = inlined_call_operand.vmem [shape: f32[4,1], index: 1, kind: input, shape index: {}]   ;;  %s266_s2 = inlined_call_operand.vmem [shape: f32[4,1], index: 2, kind: input, shape index: {}]   ;;  %s267_s3 = inlined_call_operand.hbm [shape: f32[2,4,256], index: 3, kind: output, shape index: {}]  }
   0x1   :  { %9 = vsyncpa [#allocation4], 0  ;;  %s190_s12 = smov [#allocation2]   ;;  %s142_s16 = scalar_lea.hbm %s264_s0, 256 }
   0x2   :  { %s15_s13 = sshll.u32 %s190_s12, 4  ;;  %p143_p0 = scmp.ne.s32.totalorder %s264_s0, %s142_s16  ;;  %s16_s13 = int_to_ptr.vmem [resolvable:$true] %s15_s13 }
   0x3   :  { %p146_p1 = scmp.lt.u32.totalorder %s142_s16, %s264_s0 }
   0x5   :  { %p148_p2 = pnand %p146_p1, %p143_p0 }
   0x7   :  { %151 = shalt.err (!%p148_p2)
}
   0x8   :  { %s152_s21 = scalar_lea.vmem %s16_s13, 256  ;;  %p157_p4 = scmp.lt.s32.totalorder %s16_s13, %s16_s13 }
   0x9   :  { %p153_p3 = scmp.ne.s32.totalorder %s16_s13, %s152_s21  ;;  %p158_p5 = scmp.lt.s32.totalorder %s152_s21, %s152_s21 }
   0xb   :  { %p159_p6 = por %p158_p5, %p157_p4 }
   0xd   :  { %p160_p7 = pnand %p159_p6, %p153_p3 }
   0xf   :  { %163 = shalt.err (!%p160_p7)
}
  0x10   :  { %s191_s22 = smov 128   ;;  %s192_s23 = smov 8  }
  0x11   :  { %21 = dma.hbm_to_vmem [thread:$0]  %s264_s0, 256, %s16_s13, [#allocation3], %s191_s22, %s191_s22, %s192_s23  }
  0x12   :  { %186 = dma.done.wait [#allocation3], 256  }
  0x13   :  { %187 = vsyncadd [#allocation3], 4294967040  ;;  %vm37_vm0 = vcmask 1043456   ;;  %v29_v0 = vld [vmem:[#allocation2] sm:$0xff]  ;;  %v30_v1 = vld [vmem:[#allocation2 + $0x8] sm:$0xff]  ;;  %v193_v20 = vmov 0   ;;  %v90_v44 = vlaneseq }
  0x14   :  { %v33_v2 = vcombine.high %v29_v0, %v29_v0  ;;  %v38_v3 = vsel %vm37_vm0, %v29_v0, 0.0  ;;  %v51_v4 = vmul.f32 %v29_v0, %v29_v0  ;;  %v34_v5 = vcombine.high %v30_v1, %v30_v1  ;;  %136 = vset.pattern.permute.xlu0 %v193_v20  ;;  %137 = vset.pattern.permute.xlu1 %v193_v20  ;;  %v78_v36 = vld [vmem:[%s265_s1] sm:$0xf]  ;;  %s195_s1 = smov [#allocation5]  }
  0x15   :  { %v43_v6 = vsel %vm37_vm0, %v30_v1, 0.0  ;;  %v52_v7 = vmul.f32 %v30_v1, %v30_v1  ;;  %v80_v39 = vld [vmem:[%s266_s2] sm:$0xf]  ;;  %v194_v42 = vmov 839922192   ;;  %v91_v46 = vshrl.u32 %v90_v44, 7 }
  0x16   :  { %v39_v8 = vsel %vm37_vm0, %v33_v2, 0.0  ;;  %v55_v9 = vcombine.high %v51_v4, %v51_v4  ;;  %v59_v10 = vsel %vm37_vm0, %v51_v4, 0.0  ;;  %v44_v11 = vsel %vm37_vm0, %v34_v5, 0.0  ;;  %s118_s29 = sshll.u32 %s195_s1, 4  ;;  %s119_s29 = int_to_ptr.vmem [resolvable:$true] %s118_s29 }
  0x17   :  { %v40_v12 = vadd.f32 %v39_v8, %v38_v3  ;;  %v56_v13 = vcombine.high %v52_v7, %v52_v7  ;;  %v64_v15 = vsel %vm37_vm0, %v52_v7, 0.0  ;;  %v45_v17 = vadd.f32 %v44_v11, %v43_v6  ;;  %s164_s2 = scalar_lea.vmem %s119_s29, 256  ;;  %p169_p9 = scmp.lt.s32.totalorder %s119_s29, %s119_s29 }
  0x18   :  { %v60_v14 = vsel %vm37_vm0, %v55_v9, 0.0  ;;  %v88_v43 = vunpack.c.l.s4 %v194_v42  ;;  %p165_p8 = scmp.ne.s32.totalorder %s119_s29, %s164_s2  ;;  %p170_p10 = scmp.lt.s32.totalorder %s164_s2, %s164_s2 }
  0x19   :  { %41 = vadd.xlane.f32.xlu0 %v40_v12  ;;  %v61_v16 = vadd.f32 %v60_v14, %v59_v10  ;;  %v65_v18 = vsel %vm37_vm0, %v56_v13, 0.0 }
  0x1a   :  { %v66_v19 = vadd.f32 %v65_v18, %v64_v15  ;;  %v89_v45 = vunpack.c.0.s8 %v88_v43  ;;  %p171_p11 = por %p170_p10, %p169_p9 }
  0x1b   :  { %62 = vadd.xlane.f32.xlu1 %v61_v16 }
  0x1c   :  { %v92_v47 = vsub.s32 %v89_v45, %v91_v46  ;;  %p172_p12 = pnand %p171_p11, %p165_p8 }
  0x1d   :  { %46 = vadd.xlane.f32.xlu0 %v45_v17 }
  0x1f   :  { %67 = vadd.xlane.f32.xlu1 %v66_v19 }
  0xa6   :  { %v42_v21 = vpop.xlane.xlu0 %41 }
  0xa7   :  { %v48_v24 = vsel %vm37_vm0, %v42_v21, 0.0 }
  0xa8   :  { %v63_v22 = vpop.xlane.xlu1 %62 }
  0xa9   :  { %v69_v30 = vsel %vm37_vm0, %v63_v22, 0.0 }
  0xaa   :  { %v47_v23 = vpop.xlane.xlu0 %46 }
  0xab   :  { %v49_v25 = vsel %vm37_vm0, %v47_v23, 0.0 }
  0xac   :  { %v50_v26 = vadd.f32 %v49_v25, %v48_v24  ;;  %v68_v27 = vpop.xlane.xlu1 %67 }
  0xad   :  { %v70_v28 = vsel %vm37_vm0, %v68_v27, 0.0 }
  0xae   :  { %v72_v29 = vmul.f32 0.001953125, %v50_v26  ;;  %v71_v32 = vadd.f32 %v70_v28, %v69_v30 }
  0xb0   :  { %v73_v31 = vmul.f32 %v72_v29, %v50_v26 }
  0xb2   :  { %v74_v33 = vsub.f32 %v71_v32, %v73_v31 }
  0xb4   :  { %v75_v34 = vmul.f32 0.001953125, %v74_v33 }
  0xb6   :  { %v76_v35 = vadd.f32 1e-05, %v75_v34 }
  0xb8   :  { %140 = vrsqrt.f32 %v76_v35 }
  0xc2   :  { %v141_v37 = vpop.eup %140 }
  0xc3   :  { %v79_v38 = vmul.f32 %v141_v37, %v78_v36 }
  0xc5   :  { %85 = vperm.xlu0 %136, %v79_v38   ;;  %v81_v40 = vmul.f32 %v79_v38, %v72_v29 }
  0xc7   :  { %v82_v41 = vsub.f32 %v80_v39, %v81_v40 }
  0xc9   :  { %99 = vperm.xlu1 %137, %v82_v41  }
 0x144   :  { %v86_v48 = vpop.permute.xlu0 %85 }
 0x145   :  { %v93_v49 = vrot.slane %v86_v48, %v92_v47 }
 0x147   :  { %v95_v51 = vmul.f32 %v93_v49, %v29_v0  ;;  %v96_v52 = vmul.f32 %v93_v49, %v30_v1 }
 0x148   :  { %v100_v50 = vpop.permute.xlu1 %99 }
 0x149   :  { %v107_v53 = vrot.slane %v100_v50, %v92_v47 }
 0x14b   :  { %v109_v54 = vadd.f32 %v107_v53, %v95_v51  ;;  %v110_v55 = vadd.f32 %v107_v53, %v96_v52 }
 0x14d   :  { %111 = vst [vmem:[#allocation5] sm:$0xff] %v109_v54  ;;  %112 = vst [vmem:[#allocation5 + $0x8] sm:$0xff] %v110_v55 }
 0x14e   :  { %175 = shalt.err (!%p172_p12)
}
 0x14f   :  { %s176_s5 = scalar_lea.hbm %s267_s3, 256 }
 0x150   :  { %p177_p13 = scmp.ne.s32.totalorder %s267_s3, %s176_s5  ;;  %p180_p0 = scmp.lt.u32.totalorder %s176_s5, %s267_s3 }
 0x152   :  { %p182_p1 = pnand %p180_p0, %p177_p13 }
 0x154   :  { %185 = shalt.err (!%p182_p1)
}
 0x155   :  { %124 = dma.vmem_to_hbm [thread:$0]  %s119_s29, 256, %s267_s3, [#allocation4], %s191_s22, %s191_s22, %s192_s23  }
 0x156   :  { %188 = dma.done.wait [#allocation4], 256  }
 0x157   :  { %189 = vsyncadd [#allocation4], 4294967040 }
 0x158   :  { %128 = vsyncpa [#allocation3], 1 }
 0x159   :  { %129 = vsyncpa [#allocation4], 1 }

</bundles_post_ra>
